<compile_context>
chip_gen: v7x
topology: tpu7x:2x2x1
jax: 0.10.0
libtpu: 0.0.40
codegen_flags: <defaults>
</compile_context>

<pallas_src>
import jax
import jax.numpy as jnp
from jax.experimental import pallas as pl
from jax.experimental.pallas import tpu as pltpu


def growth_kernel(x_ref, w_in_ref, b_in_ref, z0_ref, v0_ref, alpha_ref,
                  w_out_ref, b_out_ref, o_ref, cat_ref):
    t, bb, dm = x_ref.shape

    # ---- in_proj over the whole block: one (t*bb, dm) @ (dm, dm) MXU matmul.
    x2 = x_ref[...].reshape(t * bb, dm)
    vals = jnp.dot(x2, w_in_ref[...],
                   preferred_element_type=jnp.float32) + b_in_ref[...]

    # cat scratch (time-major): row 0 = v0 (broadcast), rows 1..t = raw values.
    cat_ref[0, :, :] = jnp.broadcast_to(v0_ref[...], (bb, dm))
    cat_ref[pl.ds(1, t), :, :] = vals.reshape(t, bb, dm)

    # ---- exponential smoothing: t-step recurrence over full (bb, dm) tiles.
    alpha = alpha_ref[...]                        # (1, dm) per-feature alpha
    om_alpha = 1.0 - alpha
    prev0 = jnp.broadcast_to(z0_ref[...], (bb, dm))
    s0 = jnp.broadcast_to(v0_ref[...], (bb, dm))

    def body(j, carry):
        prev, s = carry
        v = cat_ref[j + 1]                        # raw values[j]   (bb, dm)
        s = alpha * s + om_alpha * (v - prev)     # es[j]
        cat_ref[j + 1] = s                        # overwrite row in place
        return (v, s)

    # TODO(synk): for t >> 128, replace the scan with chunked lower-triangular
    # (Tc, Tc) MXU matmuls + alpha^Tc carry to shorten the serial VPU chain.
    unroll = t if t <= 32 else 8
    jax.lax.fori_loop(0, t, body, (prev0, s0), unroll=unroll)

    # ---- out_proj of [v0 ; es]: one matmul, one dense aligned output store.
    cat2 = cat_ref[...].reshape((t + 1) * bb, dm)
    y = jnp.dot(cat2, w_out_ref[...],
                preferred_element_type=jnp.float32) + b_out_ref[...]
    o_ref[...] = y.reshape(t + 1, bb, dm).astype(o_ref.dtype)


def growth_layer_forward(x, w_in_T, b_in, z0_flat, v0_flat, alpha_feat,
                         w_out_T, b_out, *, block_batch=None, operand_dtype=None):
    b, t, dm = x.shape

    if block_batch is None:
        # Target ~1-2K matmul rows per grid step (amortizes per-step overhead,
        # keeps the MXU fed) while the per-step footprint stays well inside the
        # default scoped VMEM on v5e/v6e/v7x at ETSFormer-scale dm.
        block_batch = 1
        for d in range(1, b + 1):
            if b % d == 0 and d * (t + 1) <= 2048:
                block_batch = d
        # v7x megacore: keep >= 2 grid steps when that still leaves >=512 rows.
        if block_batch == b and (b // 2) * (t + 1) >= 512:
            for d in range(b // 2, 0, -1):
                if b % d == 0:
                    block_batch = d
                    break
    assert b % block_batch == 0, "block_batch must divide batch"

    # Time-major activations: every scan step then touches one contiguous
    # (block_batch, dm) tile, and the output store is a single aligned slab.
    x_t = jnp.transpose(x, (1, 0, 2))
    if operand_dtype is not None:
        # bf16 operand storage for v6e/v7x (scan/accumulation stay f32).
        x_t = x_t.astype(operand_dtype)
        w_in_T = w_in_T.astype(operand_dtype)
        w_out_T = w_out_T.astype(operand_dtype)

    grid_spec = pltpu.PrefetchScalarGridSpec(
        num_scalar_prefetch=0,
        grid=(b // block_batch,),
        in_specs=[
            pl.BlockSpec((t, block_batch, dm), lambda i: (0, i, 0)),   # x (time-major)
            pl.BlockSpec((dm, dm), lambda i: (0, 0)),                  # W_in^T
            pl.BlockSpec((1, dm), lambda i: (0, 0)),                   # b_in
            pl.BlockSpec((1, dm), lambda i: (0, 0)),                   # z0 (h*dh)
            pl.BlockSpec((1, dm), lambda i: (0, 0)),                   # v0 (h*dh)
            pl.BlockSpec((1, dm), lambda i: (0, 0)),                   # alpha per feature
            pl.BlockSpec((dm, dm), lambda i: (0, 0)),                  # W_out^T
            pl.BlockSpec((1, dm), lambda i: (0, 0)),                   # b_out
        ],
        out_specs=pl.BlockSpec((t + 1, block_batch, dm), lambda i: (0, i, 0)),
        scratch_shapes=[pltpu.VMEM((t + 1, block_batch, dm), jnp.float32)],
    )
    out_t = pl.pallas_call(
        growth_kernel,
        out_shape=jax.ShapeDtypeStruct((t + 1, b, dm), x.dtype),
        grid_spec=grid_spec,
        compiler_params=pltpu.CompilerParams(
            dimension_semantics=("parallel",)),
    )(x_t, w_in_T, b_in, z0_flat, v0_flat, alpha_feat, w_out_T, b_out)
    return jnp.transpose(out_t, (1, 0, 2))


def reference_forward(x, z0, sw, v0, w_in, b_in, w_out, b_out):
    """Pure-JAX reference (same closed form as the PyTorch module in eval mode)."""
    b, t, dm = x.shape
    nhead, d_head = z0.shape
    values = (x @ w_in.T + b_in).reshape(b, t, nhead, d_head)
    v = jnp.concatenate(
        [jnp.broadcast_to(z0[None, None], (b, 1, nhead, d_head)), values], axis=1)
    diff = v[:, 1:] - v[:, :-1]                                     # (b,t,h,d)

    alpha = jax.nn.sigmoid(sw)[:, 0]                                # (h,)
    powers = jnp.arange(t, dtype=jnp.float32)
    jm = powers[:, None] - powers[None, :]                          # (t,t)
    A = (1.0 - alpha)[None, None, :] * jnp.where(
        jm[:, :, None] >= 0, alpha[None, None, :] ** jm[:, :, None], 0.0)
    es = jnp.einsum('jmh,bmhd->bjhd', A, diff)
    init_w = alpha[None, :] ** (powers[:, None] + 1.0)              # (t,h)
    es = es + init_w[None, :, :, None] * v0                         # v0: (1,1,h,d)

    out = jnp.concatenate(
        [jnp.broadcast_to(v0, (b, 1, nhead, d_head)), es], axis=1)
    out = out.reshape(b, t + 1, dm)
    return out @ w_out.T + b_out


if __name__ == "__main__":
    b, t = 2, 8
    d_model, nhead = 32, 4
    d_head = d_model // nhead

    key = jax.random.PRNGKey(0)
    ks = jax.random.split(key, 8)
    x = jax.random.normal(ks[0], (b, t, d_model), jnp.float32)

    # deterministic parameter init (shapes as in the PyTorch __init__)
    z0 = jax.random.normal(ks[1], (nhead, d_head), jnp.float32)
    sw = jax.random.normal(ks[2], (nhead, 1), jnp.float32)          # _smoothing_weight
    v0 = jax.random.normal(ks[3], (1, 1, nhead, d_head), jnp.float32)
    w_in = jax.random.normal(ks[4], (d_model, d_model), jnp.float32) / jnp.sqrt(d_model)
    b_in = jax.random.normal(ks[5], (d_model,), jnp.float32) * 0.1
    w_out = jax.random.normal(ks[6], (d_model, d_model), jnp.float32) / jnp.sqrt(d_model)
    b_out = jax.random.normal(ks[7], (d_model,), jnp.float32) * 0.1
    # TODO(synk): dropout is stochastic training-time behavior; kernel implements eval mode (identity).

    # ---- glue: per-feature smoothing factor (each head's alpha repeated d_head times) ----
    alpha = jax.nn.sigmoid(sw)[:, 0]                                # (h,)
    alpha_feat = jnp.repeat(alpha, d_head).reshape(1, d_model)      # (1, dm)
    z0_flat = z0.reshape(1, d_model)
    v0_flat = v0.reshape(1, d_model)

    out = growth_layer_forward(
        x, w_in.T, b_in.reshape(1, -1), z0_flat, v0_flat, alpha_feat,
        w_out.T, b_out.reshape(1, -1))
    out = jax.block_until_ready(out)

    ref = reference_forward(x, z0, sw, v0, w_in, b_in, w_out, b_out)
    assert out.shape == (b, t + 1, d_model)
    assert jnp.allclose(out, ref, atol=1e-4, rtol=1e-4), \
        f"max abs err = {jnp.max(jnp.abs(out - ref))}"

    print("KERNEL_OK")
</pallas_src>

<mosaic_0001>
module attributes {stable_mosaic.version = 11 : i64} {
  func.func @growth_kernel(%arg0: i32, %arg1: memref<8x2x32xf32, #tpu.memory_space<vmem>>, %arg2: memref<32x32xf32, #tpu.memory_space<vmem>>, %arg3: memref<1x32xf32, #tpu.memory_space<vmem>>, %arg4: memref<1x32xf32, #tpu.memory_space<vmem>>, %arg5: memref<1x32xf32, #tpu.memory_space<vmem>>, %arg6: memref<1x32xf32, #tpu.memory_space<vmem>>, %arg7: memref<32x32xf32, #tpu.memory_space<vmem>>, %arg8: memref<1x32xf32, #tpu.memory_space<vmem>>, %arg9: memref<9x2x32xf32, #tpu.memory_space<vmem>>, %arg10: memref<9x2x32xf32, #tpu.memory_space<vmem>>) attributes {dimension_semantics = [#tpu.dimension_semantics<parallel>], iteration_bounds = array<i64: 1>, scalar_prefetch = 0 : i64, scratch_operands = 1 : i64, tpu.core_type = #tpu.core_type<tc>, window_params = [{transform_indices = @transform_0, window_bounds = array<i64: 8, 2, 32>}, {pipeline_mode = #tpu.pipeline_mode<synchronous>, transform_indices = @transform_1, window_bounds = array<i64: 32, 32>}, {pipeline_mode = #tpu.pipeline_mode<synchronous>, transform_indices = @transform_2, window_bounds = array<i64: 1, 32>}, {pipeline_mode = #tpu.pipeline_mode<synchronous>, transform_indices = @transform_3, window_bounds = array<i64: 1, 32>}, {pipeline_mode = #tpu.pipeline_mode<synchronous>, transform_indices = @transform_4, window_bounds = array<i64: 1, 32>}, {pipeline_mode = #tpu.pipeline_mode<synchronous>, transform_indices = @transform_5, window_bounds = array<i64: 1, 32>}, {pipeline_mode = #tpu.pipeline_mode<synchronous>, transform_indices = @transform_6, window_bounds = array<i64: 32, 32>}, {pipeline_mode = #tpu.pipeline_mode<synchronous>, transform_indices = @transform_7, window_bounds = array<i64: 1, 32>}, {transform_indices = @transform_8, window_bounds = array<i64: 9, 2, 32>}]} {
    %c0 = arith.constant 0 : index
    %c0_0 = arith.constant 0 : index
    %c0_1 = arith.constant 0 : index
    %0 = vector.load %arg1[%c0, %c0_0, %c0_1] : memref<8x2x32xf32, #tpu.memory_space<vmem>>, vector<8x2x32xf32>
    %1 = vector.shape_cast %0 : vector<8x2x32xf32> to vector<16x32xf32>
    %c0_2 = arith.constant 0 : index
    %c0_3 = arith.constant 0 : index
    %2 = vector.load %arg2[%c0_2, %c0_3] : memref<32x32xf32, #tpu.memory_space<vmem>>, vector<32x32xf32>
    %cst = arith.constant dense<0.000000e+00> : vector<16x32xf32>
    %3 = tpu.matmul %1, %2, %cst {dimension_numbers = #tpu.dot_dimension_numbers<[1], [0], [0], [1], [0, 0, 1, 1], [], []>} : vector<16x32xf32>, vector<32x32xf32>, vector<16x32xf32> -> vector<16x32xf32>
    %c0_4 = arith.constant 0 : index
    %c0_5 = arith.constant 0 : index
    %4 = vector.load %arg3[%c0_4, %c0_5] : memref<1x32xf32, #tpu.memory_space<vmem>>, vector<1x32xf32>
    %5 = vector.broadcast %4 : vector<1x32xf32> to vector<16x32xf32>
    %6 = arith.addf %3, %5 : vector<16x32xf32>
    %c0_6 = arith.constant 0 : index
    %c0_7 = arith.constant 0 : index
    %7 = vector.load %arg5[%c0_6, %c0_7] : memref<1x32xf32, #tpu.memory_space<vmem>>, vector<1x32xf32>
    %8 = vector.shape_cast %7 : vector<1x32xf32> to vector<1x32xf32>
    %9 = vector.broadcast %8 : vector<1x32xf32> to vector<2x32xf32>
    %c0_8 = arith.constant 0 : index
    %c0_9 = arith.constant 0 : index
    %c0_10 = arith.constant 0 : index
    %10 = vector.load %arg10[%c0_8, %c0_9, %c0_10] : memref<9x2x32xf32, #tpu.memory_space<vmem>>, vector<1x2x32xf32>
    %11 = vector.shape_cast %10 : vector<1x2x32xf32> to vector<2x32xf32>
    %12 = vector.shape_cast %9 : vector<2x32xf32> to vector<1x2x32xf32>
    tpu.vector_store %arg10[%c0_8, %c0_9, %c0_10], %12 {strides = array<i32>} : memref<9x2x32xf32, #tpu.memory_space<vmem>>, vector<1x2x32xf32>,
    %13 = vector.shape_cast %6 : vector<16x32xf32> to vector<8x2x32xf32>
    %c1 = arith.constant 1 : index
    %c0_11 = arith.constant 0 : index
    %c0_12 = arith.constant 0 : index
    %14 = vector.load %arg10[%c1, %c0_11, %c0_12] : memref<9x2x32xf32, #tpu.memory_space<vmem>>, vector<8x2x32xf32>
    tpu.vector_store %arg10[%c1, %c0_11, %c0_12], %13 {strides = array<i32>} : memref<9x2x32xf32, #tpu.memory_space<vmem>>, vector<8x2x32xf32>,
    %c0_13 = arith.constant 0 : index
    %c0_14 = arith.constant 0 : index
    %15 = vector.load %arg6[%c0_13, %c0_14] : memref<1x32xf32, #tpu.memory_space<vmem>>, vector<1x32xf32>
    %cst_15 = arith.constant 1.000000e+00 : f32
    %16 = vector.broadcast %cst_15 : f32 to vector<1x32xf32>
    %17 = arith.subf %16, %15 : vector<1x32xf32>
    %c0_16 = arith.constant 0 : index
    %c0_17 = arith.constant 0 : index
    %18 = vector.load %arg4[%c0_16, %c0_17] : memref<1x32xf32, #tpu.memory_space<vmem>>, vector<1x32xf32>
    %19 = vector.shape_cast %18 : vector<1x32xf32> to vector<1x32xf32>
    %20 = vector.broadcast %19 : vector<1x32xf32> to vector<2x32xf32>
    %c0_18 = arith.constant 0 : index
    %c0_19 = arith.constant 0 : index
    %21 = vector.load %arg5[%c0_18, %c0_19] : memref<1x32xf32, #tpu.memory_space<vmem>>, vector<1x32xf32>
    %22 = vector.shape_cast %21 : vector<1x32xf32> to vector<1x32xf32>
    %23 = vector.broadcast %22 : vector<1x32xf32> to vector<2x32xf32>
    %c0_i32 = arith.constant 0 : i32
    %c1_i32 = arith.constant 1 : i32
    %24 = arith.addi %c0_i32, %c1_i32 : i32
    %25 = arith.index_cast %24 : i32 to index
    %c0_20 = arith.constant 0 : index
    %c0_21 = arith.constant 0 : index
    %26 = vector.load %arg10[%25, %c0_20, %c0_21] : memref<9x2x32xf32, #tpu.memory_space<vmem>>, vector<1x2x32xf32>
    %27 = vector.shape_cast %26 : vector<1x2x32xf32> to vector<2x32xf32>
    %28 = vector.broadcast %15 : vector<1x32xf32> to vector<2x32xf32>
    %29 = arith.mulf %28, %23 : vector<2x32xf32>
    %30 = arith.subf %27, %20 : vector<2x32xf32>
    %31 = vector.broadcast %17 : vector<1x32xf32> to vector<2x32xf32>
    %32 = arith.mulf %31, %30 : vector<2x32xf32>
    %33 = arith.addf %29, %32 : vector<2x32xf32>
    %c1_i32_22 = arith.constant 1 : i32
    %34 = arith.addi %c0_i32, %c1_i32_22 : i32
    %35 = arith.index_cast %34 : i32 to index
    %c0_23 = arith.constant 0 : index
    %c0_24 = arith.constant 0 : index
    %36 = vector.load %arg10[%35, %c0_23, %c0_24] : memref<9x2x32xf32, #tpu.memory_space<vmem>>, vector<1x2x32xf32>
    %37 = vector.shape_cast %36 : vector<1x2x32xf32> to vector<2x32xf32>
    %38 = vector.shape_cast %33 : vector<2x32xf32> to vector<1x2x32xf32>
    tpu.vector_store %arg10[%35, %c0_23, %c0_24], %38 {strides = array<i32>} : memref<9x2x32xf32, #tpu.memory_space<vmem>>, vector<1x2x32xf32>,
    %c1_i32_25 = arith.constant 1 : i32
    %c1_i32_26 = arith.constant 1 : i32
    %39 = arith.addi %c1_i32_25, %c1_i32_26 : i32
    %40 = arith.index_cast %39 : i32 to index
    %c0_27 = arith.constant 0 : index
    %c0_28 = arith.constant 0 : index
    %41 = vector.load %arg10[%40, %c0_27, %c0_28] : memref<9x2x32xf32, #tpu.memory_space<vmem>>, vector<1x2x32xf32>
    %42 = vector.shape_cast %41 : vector<1x2x32xf32> to vector<2x32xf32>
    %43 = vector.broadcast %15 : vector<1x32xf32> to vector<2x32xf32>
    %44 = arith.mulf %43, %33 : vector<2x32xf32>
    %45 = arith.subf %42, %27 : vector<2x32xf32>
    %46 = vector.broadcast %17 : vector<1x32xf32> to vector<2x32xf32>
    %47 = arith.mulf %46, %45 : vector<2x32xf32>
    %48 = arith.addf %44, %47 : vector<2x32xf32>
    %c1_i32_29 = arith.constant 1 : i32
    %49 = arith.addi %c1_i32_25, %c1_i32_29 : i32
    %50 = arith.index_cast %49 : i32 to index
    %c0_30 = arith.constant 0 : index
    %c0_31 = arith.constant 0 : index
    %51 = vector.load %arg10[%50, %c0_30, %c0_31] : memref<9x2x32xf32, #tpu.memory_space<vmem>>, vector<1x2x32xf32>
    %52 = vector.shape_cast %51 : vector<1x2x32xf32> to vector<2x32xf32>
    %53 = vector.shape_cast %48 : vector<2x32xf32> to vector<1x2x32xf32>
    tpu.vector_store %arg10[%50, %c0_30, %c0_31], %53 {strides = array<i32>} : memref<9x2x32xf32, #tpu.memory_space<vmem>>, vector<1x2x32xf32>,
    %c2_i32 = arith.constant 2 : i32
    %c1_i32_32 = arith.constant 1 : i32
    %54 = arith.addi %c2_i32, %c1_i32_32 : i32
    %55 = arith.index_cast %54 : i32 to index
    %c0_33 = arith.constant 0 : index
    %c0_34 = arith.constant 0 : index
    %56 = vector.load %arg10[%55, %c0_33, %c0_34] : memref<9x2x32xf32, #tpu.memory_space<vmem>>, vector<1x2x32xf32>
    %57 = vector.shape_cast %56 : vector<1x2x32xf32> to vector<2x32xf32>
    %58 = vector.broadcast %15 : vector<1x32xf32> to vector<2x32xf32>
    %59 = arith.mulf %58, %48 : vector<2x32xf32>
    %60 = arith.subf %57, %42 : vector<2x32xf32>
    %61 = vector.broadcast %17 : vector<1x32xf32> to vector<2x32xf32>
    %62 = arith.mulf %61, %60 : vector<2x32xf32>
    %63 = arith.addf %59, %62 : vector<2x32xf32>
    %c1_i32_35 = arith.constant 1 : i32
    %64 = arith.addi %c2_i32, %c1_i32_35 : i32
    %65 = arith.index_cast %64 : i32 to index
    %c0_36 = arith.constant 0 : index
    %c0_37 = arith.constant 0 : index
    %66 = vector.load %arg10[%65, %c0_36, %c0_37] : memref<9x2x32xf32, #tpu.memory_space<vmem>>, vector<1x2x32xf32>
    %67 = vector.shape_cast %66 : vector<1x2x32xf32> to vector<2x32xf32>
    %68 = vector.shape_cast %63 : vector<2x32xf32> to vector<1x2x32xf32>
    tpu.vector_store %arg10[%65, %c0_36, %c0_37], %68 {strides = array<i32>} : memref<9x2x32xf32, #tpu.memory_space<vmem>>, vector<1x2x32xf32>,
    %c3_i32 = arith.constant 3 : i32
    %c1_i32_38 = arith.constant 1 : i32
    %69 = arith.addi %c3_i32, %c1_i32_38 : i32
    %70 = arith.index_cast %69 : i32 to index
    %c0_39 = arith.constant 0 : index
    %c0_40 = arith.constant 0 : index
    %71 = vector.load %arg10[%70, %c0_39, %c0_40] : memref<9x2x32xf32, #tpu.memory_space<vmem>>, vector<1x2x32xf32>
    %72 = vector.shape_cast %71 : vector<1x2x32xf32> to vector<2x32xf32>
    %73 = vector.broadcast %15 : vector<1x32xf32> to vector<2x32xf32>
    %74 = arith.mulf %73, %63 : vector<2x32xf32>
    %75 = arith.subf %72, %57 : vector<2x32xf32>
    %76 = vector.broadcast %17 : vector<1x32xf32> to vector<2x32xf32>
    %77 = arith.mulf %76, %75 : vector<2x32xf32>
    %78 = arith.addf %74, %77 : vector<2x32xf32>
    %c1_i32_41 = arith.constant 1 : i32
    %79 = arith.addi %c3_i32, %c1_i32_41 : i32
    %80 = arith.index_cast %79 : i32 to index
    %c0_42 = arith.constant 0 : index
    %c0_43 = arith.constant 0 : index
    %81 = vector.load %arg10[%80, %c0_42, %c0_43] : memref<9x2x32xf32, #tpu.memory_space<vmem>>, vector<1x2x32xf32>
    %82 = vector.shape_cast %81 : vector<1x2x32xf32> to vector<2x32xf32>
    %83 = vector.shape_cast %78 : vector<2x32xf32> to vector<1x2x32xf32>
    tpu.vector_store %arg10[%80, %c0_42, %c0_43], %83 {strides = array<i32>} : memref<9x2x32xf32, #tpu.memory_space<vmem>>, vector<1x2x32xf32>,
    %c4_i32 = arith.constant 4 : i32
    %c1_i32_44 = arith.constant 1 : i32
    %84 = arith.addi %c4_i32, %c1_i32_44 : i32
    %85 = arith.index_cast %84 : i32 to index
    %c0_45 = arith.constant 0 : index
    %c0_46 = arith.constant 0 : index
    %86 = vector.load %arg10[%85, %c0_45, %c0_46] : memref<9x2x32xf32, #tpu.memory_space<vmem>>, vector<1x2x32xf32>
    %87 = vector.shape_cast %86 : vector<1x2x32xf32> to vector<2x32xf32>
    %88 = vector.broadcast %15 : vector<1x32xf32> to vector<2x32xf32>
    %89 = arith.mulf %88, %78 : vector<2x32xf32>
    %90 = arith.subf %87, %72 : vector<2x32xf32>
    %91 = vector.broadcast %17 : vector<1x32xf32> to vector<2x32xf32>
    %92 = arith.mulf %91, %90 : vector<2x32xf32>
    %93 = arith.addf %89, %92 : vector<2x32xf32>
    %c1_i32_47 = arith.constant 1 : i32
    %94 = arith.addi %c4_i32, %c1_i32_47 : i32
    %95 = arith.index_cast %94 : i32 to index
    %c0_48 = arith.constant 0 : index
    %c0_49 = arith.constant 0 : index
    %96 = vector.load %arg10[%95, %c0_48, %c0_49] : memref<9x2x32xf32, #tpu.memory_space<vmem>>, vector<1x2x32xf32>
    %97 = vector.shape_cast %96 : vector<1x2x32xf32> to vector<2x32xf32>
    %98 = vector.shape_cast %93 : vector<2x32xf32> to vector<1x2x32xf32>
    tpu.vector_store %arg10[%95, %c0_48, %c0_49], %98 {strides = array<i32>} : memref<9x2x32xf32, #tpu.memory_space<vmem>>, vector<1x2x32xf32>,
    %c5_i32 = arith.constant 5 : i32
    %c1_i32_50 = arith.constant 1 : i32
    %99 = arith.addi %c5_i32, %c1_i32_50 : i32
    %100 = arith.index_cast %99 : i32 to index
    %c0_51 = arith.constant 0 : index
    %c0_52 = arith.constant 0 : index
    %101 = vector.load %arg10[%100, %c0_51, %c0_52] : memref<9x2x32xf32, #tpu.memory_space<vmem>>, vector<1x2x32xf32>
    %102 = vector.shape_cast %101 : vector<1x2x32xf32> to vector<2x32xf32>
    %103 = vector.broadcast %15 : vector<1x32xf32> to vector<2x32xf32>
    %104 = arith.mulf %103, %93 : vector<2x32xf32>
    %105 = arith.subf %102, %87 : vector<2x32xf32>
    %106 = vector.broadcast %17 : vector<1x32xf32> to vector<2x32xf32>
    %107 = arith.mulf %106, %105 : vector<2x32xf32>
    %108 = arith.addf %104, %107 : vector<2x32xf32>
    %c1_i32_53 = arith.constant 1 : i32
    %109 = arith.addi %c5_i32, %c1_i32_53 : i32
    %110 = arith.index_cast %109 : i32 to index
    %c0_54 = arith.constant 0 : index
    %c0_55 = arith.constant 0 : index
    %111 = vector.load %arg10[%110, %c0_54, %c0_55] : memref<9x2x32xf32, #tpu.memory_space<vmem>>, vector<1x2x32xf32>
    %112 = vector.shape_cast %111 : vector<1x2x32xf32> to vector<2x32xf32>
    %113 = vector.shape_cast %108 : vector<2x32xf32> to vector<1x2x32xf32>
    tpu.vector_store %arg10[%110, %c0_54, %c0_55], %113 {strides = array<i32>} : memref<9x2x32xf32, #tpu.memory_space<vmem>>, vector<1x2x32xf32>,
    %c6_i32 = arith.constant 6 : i32
    %c1_i32_56 = arith.constant 1 : i32
    %114 = arith.addi %c6_i32, %c1_i32_56 : i32
    %115 = arith.index_cast %114 : i32 to index
    %c0_57 = arith.constant 0 : index
    %c0_58 = arith.constant 0 : index
    %116 = vector.load %arg10[%115, %c0_57, %c0_58] : memref<9x2x32xf32, #tpu.memory_space<vmem>>, vector<1x2x32xf32>
    %117 = vector.shape_cast %116 : vector<1x2x32xf32> to vector<2x32xf32>
    %118 = vector.broadcast %15 : vector<1x32xf32> to vector<2x32xf32>
    %119 = arith.mulf %118, %108 : vector<2x32xf32>
    %120 = arith.subf %117, %102 : vector<2x32xf32>
    %121 = vector.broadcast %17 : vector<1x32xf32> to vector<2x32xf32>
    %122 = arith.mulf %121, %120 : vector<2x32xf32>
    %123 = arith.addf %119, %122 : vector<2x32xf32>
    %c1_i32_59 = arith.constant 1 : i32
    %124 = arith.addi %c6_i32, %c1_i32_59 : i32
    %125 = arith.index_cast %124 : i32 to index
    %c0_60 = arith.constant 0 : index
    %c0_61 = arith.constant 0 : index
    %126 = vector.load %arg10[%125, %c0_60, %c0_61] : memref<9x2x32xf32, #tpu.memory_space<vmem>>, vector<1x2x32xf32>
    %127 = vector.shape_cast %126 : vector<1x2x32xf32> to vector<2x32xf32>
    %128 = vector.shape_cast %123 : vector<2x32xf32> to vector<1x2x32xf32>
    tpu.vector_store %arg10[%125, %c0_60, %c0_61], %128 {strides = array<i32>} : memref<9x2x32xf32, #tpu.memory_space<vmem>>, vector<1x2x32xf32>,
    %c7_i32 = arith.constant 7 : i32
    %c1_i32_62 = arith.constant 1 : i32
    %129 = arith.addi %c7_i32, %c1_i32_62 : i32
    %130 = arith.index_cast %129 : i32 to index
    %c0_63 = arith.constant 0 : index
    %c0_64 = arith.constant 0 : index
    %131 = vector.load %arg10[%130, %c0_63, %c0_64] : memref<9x2x32xf32, #tpu.memory_space<vmem>>, vector<1x2x32xf32>
    %132 = vector.shape_cast %131 : vector<1x2x32xf32> to vector<2x32xf32>
    %133 = vector.broadcast %15 : vector<1x32xf32> to vector<2x32xf32>
    %134 = arith.mulf %133, %123 : vector<2x32xf32>
    %135 = arith.subf %132, %117 : vector<2x32xf32>
    %136 = vector.broadcast %17 : vector<1x32xf32> to vector<2x32xf32>
    %137 = arith.mulf %136, %135 : vector<2x32xf32>
    %138 = arith.addf %134, %137 : vector<2x32xf32>
    %c1_i32_65 = arith.constant 1 : i32
    %139 = arith.addi %c7_i32, %c1_i32_65 : i32
    %140 = arith.index_cast %139 : i32 to index
    %c0_66 = arith.constant 0 : index
    %c0_67 = arith.constant 0 : index
    %141 = vector.load %arg10[%140, %c0_66, %c0_67] : memref<9x2x32xf32, #tpu.memory_space<vmem>>, vector<1x2x32xf32>
    %142 = vector.shape_cast %141 : vector<1x2x32xf32> to vector<2x32xf32>
    %143 = vector.shape_cast %138 : vector<2x32xf32> to vector<1x2x32xf32>
    tpu.vector_store %arg10[%140, %c0_66, %c0_67], %143 {strides = array<i32>} : memref<9x2x32xf32, #tpu.memory_space<vmem>>, vector<1x2x32xf32>,
    %c8_i32 = arith.constant 8 : i32
    %c0_68 = arith.constant 0 : index
    %c0_69 = arith.constant 0 : index
    %c0_70 = arith.constant 0 : index
    %144 = vector.load %arg10[%c0_68, %c0_69, %c0_70] : memref<9x2x32xf32, #tpu.memory_space<vmem>>, vector<9x2x32xf32>
    %145 = vector.shape_cast %144 : vector<9x2x32xf32> to vector<18x32xf32>
    %c0_71 = arith.constant 0 : index
    %c0_72 = arith.constant 0 : index
    %146 = vector.load %arg7[%c0_71, %c0_72] : memref<32x32xf32, #tpu.memory_space<vmem>>, vector<32x32xf32>
    %cst_73 = arith.constant dense<0.000000e+00> : vector<18x32xf32>
    %147 = tpu.matmul %145, %146, %cst_73 {dimension_numbers = #tpu.dot_dimension_numbers<[1], [0], [0], [1], [0, 0, 1, 1], [], []>} : vector<18x32xf32>, vector<32x32xf32>, vector<18x32xf32> -> vector<18x32xf32>
    %c0_74 = arith.constant 0 : index
    %c0_75 = arith.constant 0 : index
    %148 = vector.load %arg8[%c0_74, %c0_75] : memref<1x32xf32, #tpu.memory_space<vmem>>, vector<1x32xf32>
    %149 = vector.broadcast %148 : vector<1x32xf32> to vector<18x32xf32>
    %150 = arith.addf %147, %149 : vector<18x32xf32>
    %151 = vector.shape_cast %150 : vector<18x32xf32> to vector<9x2x32xf32>
    %c0_76 = arith.constant 0 : index
    %c0_77 = arith.constant 0 : index
    %c0_78 = arith.constant 0 : index
    %152 = vector.load %arg9[%c0_76, %c0_77, %c0_78] : memref<9x2x32xf32, #tpu.memory_space<vmem>>, vector<9x2x32xf32>
    tpu.vector_store %arg9[%c0_76, %c0_77, %c0_78], %151 {strides = array<i32>} : memref<9x2x32xf32, #tpu.memory_space<vmem>>, vector<9x2x32xf32>,
    return
  }
  func.func @transform_0(%arg0: i32) -> (i32, i32, i32) {
    %c0_i32 = arith.constant 0 : i32
    %c0_i32_0 = arith.constant 0 : i32
    %c0_i32_1 = arith.constant 0 : i32
    return %c0_i32, %arg0, %c0_i32_0 : i32, i32, i32
  }
  func.func @transform_1(%arg0: i32) -> (i32, i32) {
    %c0_i32 = arith.constant 0 : i32
    %c0_i32_0 = arith.constant 0 : i32
    %c0_i32_1 = arith.constant 0 : i32
    return %c0_i32, %c0_i32_0 : i32, i32
  }
  func.func @transform_2(%arg0: i32) -> (i32, i32) {
    %c0_i32 = arith.constant 0 : i32
    %c0_i32_0 = arith.constant 0 : i32
    %c0_i32_1 = arith.constant 0 : i32
    return %c0_i32, %c0_i32_0 : i32, i32
  }
  func.func @transform_3(%arg0: i32) -> (i32, i32) {
    %c0_i32 = arith.constant 0 : i32
    %c0_i32_0 = arith.constant 0 : i32
    %c0_i32_1 = arith.constant 0 : i32
    return %c0_i32, %c0_i32_0 : i32, i32
  }
  func.func @transform_4(%arg0: i32) -> (i32, i32) {
    %c0_i32 = arith.constant 0 : i32
    %c0_i32_0 = arith.constant 0 : i32
    %c0_i32_1 = arith.constant 0 : i32
    return %c0_i32, %c0_i32_0 : i32, i32
  }
  func.func @transform_5(%arg0: i32) -> (i32, i32) {
    %c0_i32 = arith.constant 0 : i32
    %c0_i32_0 = arith.constant 0 : i32
    %c0_i32_1 = arith.constant 0 : i32
    return %c0_i32, %c0_i32_0 : i32, i32
  }
  func.func @transform_6(%arg0: i32) -> (i32, i32) {
    %c0_i32 = arith.constant 0 : i32
    %c0_i32_0 = arith.constant 0 : i32
    %c0_i32_1 = arith.constant 0 : i32
    return %c0_i32, %c0_i32_0 : i32, i32
  }
  func.func @transform_7(%arg0: i32) -> (i32, i32) {
    %c0_i32 = arith.constant 0 : i32
    %c0_i32_0 = arith.constant 0 : i32
    %c0_i32_1 = arith.constant 0 : i32
    return %c0_i32, %c0_i32_0 : i32, i32
  }
  func.func @transform_8(%arg0: i32) -> (i32, i32, i32) {
    %c0_i32 = arith.constant 0 : i32
    %c0_i32_0 = arith.constant 0 : i32
    %c0_i32_1 = arith.constant 0 : i32
    return %c0_i32, %arg0, %c0_i32_0 : i32, i32, i32
  }
}

</mosaic_0001>

<bundles_post_ra>
// kernel: tpu_custom_call.1
= control target key start
LH: loop header
LB: loop body
LE: loop exit
PB: predicated region body
PF: predicated region fallthrough
CT: control target
= control target key end

     0   :  { %13 = vsyncpa [#allocation4], 0  ;;  %s957_s0 = inlined_call_operand.hbm [shape: f32[8,2,32], index: 0, kind: input, shape index: {}]   ;;  %s958_s1 = inlined_call_operand.hbm [shape: f32[32,32], index: 1, kind: input, shape index: {}]   ;;  %s959_s2 = inlined_call_operand.vmem [shape: f32[1,32], index: 2, kind: input, shape index: {}]   ;;  %s960_s3 = inlined_call_operand.vmem [shape: f32[1,32], index: 3, kind: input, shape index: {}]   ;;  %s961_s4 = inlined_call_operand.vmem [shape: f32[1,32], index: 4, kind: input, shape index: {}]   ;;  %s962_s5 = inlined_call_operand.vmem [shape: f32[1,32], index: 5, kind: input, shape index: {}]   ;;  %s963_s6 = inlined_call_operand.hbm [shape: f32[32,32], index: 6, kind: input, shape index: {}]   ;;  %s964_s7 = inlined_call_operand.vmem [shape: f32[1,32], index: 7, kind: input, shape index: {}]   ;;  %s965_s8 = inlined_call_operand.hbm [shape: f32[9,2,32], index: 8, kind: output, shape index: {}]  }
   0x1   :  { %14 = vsyncpa [#allocation7], 0 }
   0x2   :  { %15 = vsyncpa [#allocation5], 0  ;;  %s765_s27 = smov [#allocation6]   ;;  %s671_s9 = scalar_lea.hbm %s958_s1, 512 }
   0x3   :  { %s33_s28 = sshll.u32 %s765_s27, 4  ;;  %p672_p0 = scmp.ne.s32.totalorder %s958_s1, %s671_s9  ;;  %s34_s28 = int_to_ptr.vmem [resolvable:$true] %s33_s28 }
   0x4   :  { %p675_p1 = scmp.lt.u32.totalorder %s671_s9, %s958_s1 }
   0x6   :  { %p677_p2 = pnand %p675_p1, %p672_p0 }
   0x8   :  { %680 = shalt.err (!%p677_p2)
}
   0x9   :  { %s681_s14 = scalar_lea.vmem %s34_s28, 512  ;;  %p686_p4 = scmp.lt.s32.totalorder %s34_s28, %s34_s28 }
   0xa   :  { %p682_p3 = scmp.ne.s32.totalorder %s34_s28, %s681_s14  ;;  %p687_p5 = scmp.lt.s32.totalorder %s681_s14, %s681_s14 }
   0xc   :  { %p688_p6 = por %p687_p5, %p686_p4 }
   0xe   :  { %p689_p7 = pnand %p688_p6, %p682_p3 }
  0x10   :  { %692 = shalt.err (!%p689_p7)
}
  0x11   :  { %s766_s15 = smov 128   ;;  %s767_s16 = smov 8  }
  0x12   :  { %39 = dma.hbm_to_vmem [thread:$0]  %s958_s1, 512, %s34_s28, [#allocation7], %s766_s15, %s766_s15, %s767_s16  }
  0x13   :  { %s768_s19 = smov [#allocation3]   ;;  %s693_s23 = scalar_lea.hbm %s957_s0, 256 }
  0x14   :  { %s21_s20 = sshll.u32 %s768_s19, 4  ;;  %p694_p8 = scmp.ne.s32.totalorder %s957_s0, %s693_s23  ;;  %s22_s20 = int_to_ptr.vmem [resolvable:$true] %s21_s20 }
  0x15   :  { %p697_p9 = scmp.lt.u32.totalorder %s693_s23, %s957_s0 }
  0x17   :  { %p699_p10 = pnand %p697_p9, %p694_p8 }
  0x19   :  { %702 = shalt.err (!%p699_p10)
}
  0x1a   :  { %s703_s29 = scalar_lea.vmem %s22_s20, 256  ;;  %p708_p12 = scmp.lt.s32.totalorder %s22_s20, %s22_s20 }
  0x1b   :  { %p704_p11 = scmp.ne.s32.totalorder %s22_s20, %s703_s29  ;;  %p709_p13 = scmp.lt.s32.totalorder %s703_s29, %s703_s29 }
  0x1d   :  { %p710_p0 = por %p709_p13, %p708_p12 }
  0x1f   :  { %p711_p1 = pnand %p710_p0, %p704_p11 }
  0x21   :  { %714 = shalt.err (!%p711_p1)
}
  0x22   :  { %s769_s1 = smov 32   ;;  %s770_s28 = smov 2  }
  0x23   :  { %27 = dma.hbm_to_vmem [thread:$0]  %s957_s0, 256, %s22_s20, [#allocation4], %s769_s1, %s769_s1, %s770_s28  }
  0x24   :  { %s771_s10 = smov [#allocation8]   ;;  %s715_s14 = scalar_lea.hbm %s963_s6, 512 }
  0x25   :  { %s53_s11 = sshll.u32 %s771_s10, 4  ;;  %p716_p2 = scmp.ne.s32.totalorder %s963_s6, %s715_s14  ;;  %s54_s11 = int_to_ptr.vmem [resolvable:$true] %s53_s11 }
  0x26   :  { %p719_p3 = scmp.lt.u32.totalorder %s715_s14, %s963_s6 }
  0x28   :  { %p721_p4 = pnand %p719_p3, %p716_p2 }
  0x2a   :  { %724 = shalt.err (!%p721_p4)
}
  0x2b   :  { %s725_s22 = scalar_lea.vmem %s54_s11, 512  ;;  %p730_p6 = scmp.lt.s32.totalorder %s54_s11, %s54_s11 }
  0x2c   :  { %p726_p5 = scmp.ne.s32.totalorder %s54_s11, %s725_s22  ;;  %p731_p7 = scmp.lt.s32.totalorder %s725_s22, %s725_s22 }
  0x2e   :  { %p732_p8 = por %p731_p7, %p730_p6 }
  0x30   :  { %p733_p9 = pnand %p732_p8, %p726_p5 }
  0x32   :  { %736 = shalt.err (!%p733_p9)
}
  0x33   :  { %59 = dma.hbm_to_vmem [thread:$0]  %s963_s6, 512, %s54_s11, [#allocation7], %s766_s15, %s766_s15, %s767_s16  }
  0x34   :  { %759 = dma.done.wait [#allocation4], 256  }
  0x35   :  { %760 = vsyncadd [#allocation4], 4294967040 }
  0x36   :  { %761 = dma.done.wait [#allocation7], 1024  }
  0x37   :  { %762 = vsyncadd [#allocation7], 4294966272  ;;  %v103_v0 = vlaneseq  ;;  %v772_v1 = vmov 1983009808   ;;  %v79_v5 = vld [vmem:[#allocation6] sm:$0xff]  ;;  %v80_v6 = vld [vmem:[#allocation6 + $0x8] sm:$0xff] }
  0x38   :  { %v101_v2 = vunpack.c.l.s4 %v772_v1  ;;  %v81_v7 = vld [vmem:[#allocation6 + $0x10] sm:$0xff]  ;;  %v645_v9 = vpack.c.bf16 %v80_v6, %v79_v5  ;;  %v82_v10 = vld [vmem:[#allocation6 + $0x18] sm:$0xff]  ;;  %vm132_vm0 = vcmask 261120   ;;  %vm219_vm1 = vcmask 254976   ;;  %v366_v31 = vld [vmem:[#allocation8] sm:$0xff] }
  0x39   :  { %v867_v4 = vshrl.u32 %v103_v0, 7  ;;  %v71_v11 = vld [vmem:[#allocation3] sm:$0x3]  ;;  %v72_v12 = vld [vmem:[#allocation3 + $0x2] sm:$0x3]  ;;  %v649_v13 = vpack.c.bf16 %v82_v10, %v81_v7  ;;  %v367_v32 = vld [vmem:[#allocation8 + $0x8] sm:$0xff] }
  0x3a   :  { %v102_v3 = vunpack.c.0.s8 %v101_v2  ;;  %v73_v14 = vld [vmem:[#allocation3 + $0x4] sm:$0x3]  ;;  %v74_v15 = vld [vmem:[#allocation3 + $0x6] sm:$0x3]  ;;  %v98_v16 = vcombine.low %v71_v11, %v72_v12  ;;  %v75_v17 = vld [vmem:[#allocation3 + $0x8] sm:$0x3]  ;;  %646 = vmatprep.subr.bf16.mxu0 %v645_v9  ;;  %v654_v33 = vpack.c.bf16 %v367_v32, %v366_v31 }
  0x3b   :  { %v99_v18 = vcombine.low %v73_v14, %v74_v15  ;;  %v76_v19 = vld [vmem:[#allocation3 + $0xa] sm:$0x3]  ;;  %v77_v20 = vld [vmem:[#allocation3 + $0xc] sm:$0x3]  ;;  %v78_v21 = vld [vmem:[#allocation3 + $0xe] sm:$0x3]  ;;  %648 = vmatpush3.bf16.msra.mxu0 %v645_v9 }
  0x3c   :  { %v870_v8 = vsub.s32 %v102_v3, %v867_v4  ;;  %v115_v23 = vcombine.low %v75_v17, %v76_v19  ;;  %v116_v24 = vcombine.low %v77_v20, %v78_v21  ;;  %650 = vmatprep.subr.bf16.mxu0 %v649_v13  ;;  %v598_v30 = vld [vmem:[%s961_s4] ss:$0 sm:$0xff]  ;;  %v773_v34 = vmov 0.0|0.0   ;;  %v368_v35 = vld [vmem:[#allocation8 + $0x10] sm:$0xff] }
  0x3d   :  { %220 = vst.msk [vmem:[#allocation2] sm:$0x3] %vm219_vm1, %v598_v30  ;;  %653 = vmatprep.subr.bf16.mxu1 %v773_v34  ;;  %v369_v36 = vld [vmem:[#allocation8 + $0x18] sm:$0xff]  ;;  %vm774_vm2 = vmmov 0   ;;  %v775_v38 = vmov 0.0   ;;  %v294_v53 = vsub.s32 0, %v867_v4 }
  0x3e   :  { %v106_v22 = vrot.slane %v98_v16, %v870_v8  ;;  %v113_v25 = vrot.slane %v99_v18, %v870_v8  ;;  %v123_v26 = vrot.slane %v115_v23, %v870_v8  ;;  %v130_v27 = vrot.slane %v116_v24, %v870_v8  ;;  %655 = vmatpush3.bf16.msra.mxu1 %v654_v33  ;;  %v593_v39 = vld [vmem:[%s959_s2] ss:$0 sm:$0xff] }
  0x3f   :  { %652 = vmatpush3.bf16.msra.mxu0 %v649_v13  ;;  %656 = vmatprep.subr.bf16.mxu1 %v773_v34  ;;  %v657_v37 = vpack.c.bf16 %v369_v36, %v368_v35  ;;  %v274_v50 = vld [vmem:[%s962_s5] sm:$0x1] }
  0x40   :  { %v114_v28 = vcombine.low %v106_v22, %v113_v25  ;;  %v131_v29 = vcombine.low %v123_v26, %v130_v27  ;;  %636 = vmatprep.mubr.msk.f32.mxu1 %vm774_vm2, %v775_v38  ;;  %v275_v56 = vsub.f32 1.0, %v274_v50  ;;  %v295_v57 = vrot.slane %v274_v50, %v294_v53  ;;  %v597_v58 = vld [vmem:[%s960_s3] ss:$0 sm:$0xff] }
  0x42   :  { %625 = vmatprep.mubr.msk.f32.mxu0 %vm132_vm0, %v114_v28  ;;  %658 = vmatpush3.bf16.msra.mxu1 %v657_v37  ;;  %v303_v59 = vrot.slane %v275_v56, %v294_v53  ;;  %v297_v61 = vmul.f32 %v598_v30, %v295_v57 }
  0x43   :  { %626 = vmatmul.mubr.msk.f32.vlgmr.msra.gmra.mrb[0].mxu0 %vm132_vm0, %v131_v29 }
  0x44   :  { %v357_v20 = vld [vmem:[#allocation2] sm:$0x3] }
 0x116   :  { %v627_v40 = vpop.f32.mrb[0].mxu0 }
 0x117   :  { %v209_v41 = vadd.f32 %v627_v40, %v593_v39  ;;  %v203_v42 = vpop.f32.mrb[1].mxu0 }
 0x118   :  { %v204_v43 = vadd.f32 %v593_v39, %v203_v42 }
 0x119   :  { %v240_v44 = vcombine.high %v209_v41, %v209_v41  ;;  %v247_v45 = vrot.slane %v209_v41, %v870_v8 }
 0x11a   :  { %v223_v46 = vcombine.high %v204_v43, %v204_v43  ;;  %v230_v47 = vrot.slane %v204_v43, %v870_v8 }
 0x11b   :  { %v254_v48 = vrot.slane %v240_v44, %v870_v8  ;;  %v255_v49 = vcombine.high %v247_v45, %v247_v45  ;;  %270 = vst.msk [vmem:[#allocation2 + $0xa] sm:$0x3] %vm219_vm1, %v247_v45 }
 0x11c   :  { %v237_v51 = vrot.slane %v223_v46, %v870_v8  ;;  %v238_v52 = vcombine.high %v230_v47, %v230_v47  ;;  %266 = vst.msk [vmem:[#allocation2 + $0x2] sm:$0x3] %vm219_vm1, %v230_v47 }
 0x11d   :  { %v256_v54 = vcombine.high %v254_v48, %v254_v48  ;;  %271 = vst.msk [vmem:[#allocation2 + $0xc] sm:$0x3] %vm219_vm1, %v255_v49  ;;  %272 = vst.msk [vmem:[#allocation2 + $0xe] sm:$0x3] %vm219_vm1, %v254_v48 }
 0x11e   :  { %v239_v55 = vcombine.high %v237_v51, %v237_v51  ;;  %267 = vst.msk [vmem:[#allocation2 + $0x4] sm:$0x3] %vm219_vm1, %v238_v52  ;;  %268 = vst.msk [vmem:[#allocation2 + $0x6] sm:$0x3] %vm219_vm1, %v237_v51 }
 0x11f   :  { %273 = vst.msk [vmem:[#allocation2 + $0x10] sm:$0x3] %vm219_vm1, %v256_v54 }
 0x120   :  { %269 = vst.msk [vmem:[#allocation2 + $0x8] sm:$0x3] %vm219_vm1, %v239_v55 }
 0x122   :  { %v330_v14 = vld [vmem:[#allocation2 + $0xa] sm:$0x3] }
 0x123   :  { %v290_v60 = vld [vmem:[#allocation2 + $0x2] sm:$0x3] }
 0x124   :  { %v298_v62 = vsub.f32 %v290_v60, %v597_v58  ;;  %v337_v18 = vld [vmem:[#allocation2 + $0xc] sm:$0x3]  ;;  %v344_v25 = vld [vmem:[#allocation2 + $0xe] sm:$0x3] }
 0x125   :  { %v309_v63 = vld [vmem:[#allocation2 + $0x4] sm:$0x3]  ;;  %v316_v2 = vld [vmem:[#allocation2 + $0x6] sm:$0x3]  ;;  %v339_v24 = vsub.f32 %v337_v18, %v330_v14  ;;  %v346_v32 = vsub.f32 %v344_v25, %v337_v18 }
 0x126   :  { %v305_v0 = vmul.f32 %v303_v59, %v298_v62  ;;  %v311_v1 = vsub.f32 %v309_v63, %v290_v60  ;;  %v318_v6 = vsub.f32 %v316_v2, %v309_v63  ;;  %v351_v34 = vld [vmem:[#allocation2 + $0x10] sm:$0x3] }
 0x127   :  { %v323_v7 = vld [vmem:[#allocation2 + $0x8] sm:$0x3]  ;;  %v340_v31 = vmul.f32 %v339_v24, %v303_v59  ;;  %v347_v40 = vmul.f32 %v346_v32, %v303_v59  ;;  %v353_v41 = vsub.f32 %v351_v34, %v344_v25 }
 0x128   :  { %v306_v3 = vadd.f32 %v305_v0, %v297_v61  ;;  %v312_v5 = vmul.f32 %v311_v1, %v303_v59  ;;  %v319_v11 = vmul.f32 %v318_v6, %v303_v59  ;;  %v325_v12 = vsub.f32 %v323_v7, %v316_v2 }
 0x129   :  { %v332_v17 = vsub.f32 %v330_v14, %v323_v7  ;;  %v354_v45 = vmul.f32 %v353_v41, %v303_v59 }
 0x12a   :  { %307 = vst.msk [vmem:[#allocation2 + $0x2] sm:$0x3] %vm219_vm1, %v306_v3  ;;  %v310_v4 = vmul.f32 %v306_v3, %v295_v57  ;;  %v326_v16 = vmul.f32 %v325_v12, %v303_v59 }
 0x12b   :  { %v333_v23 = vmul.f32 %v332_v17, %v303_v59 }
 0x12c   :  { %v313_v9 = vadd.f32 %v312_v5, %v310_v4 }
 0x12e   :  { %314 = vst.msk [vmem:[#allocation2 + $0x4] sm:$0x3] %vm219_vm1, %v313_v9  ;;  %v317_v10 = vmul.f32 %v313_v9, %v295_v57 }
 0x130   :  { %v320_v13 = vadd.f32 %v319_v11, %v317_v10 }
 0x131   :  { %v358_v21 = vld [vmem:[#allocation2 + $0x2] sm:$0x3] }
 0x132   :  { %321 = vst.msk [vmem:[#allocation2 + $0x6] sm:$0x3] %vm219_vm1, %v320_v13  ;;  %v324_v15 = vmul.f32 %v320_v13, %v295_v57  ;;  %v386_v27 = vcombine.low %v357_v20, %v358_v21 }
 0x134   :  { %v327_v19 = vadd.f32 %v326_v16, %v324_v15  ;;  %v394_v36 = vrot.slane %v386_v27, %v870_v8 }
 0x135   :  { %v359_v28 = vld [vmem:[#allocation2 + $0x4] sm:$0x3] }
 0x136   :  { %328 = vst.msk [vmem:[#allocation2 + $0x8] sm:$0x3] %vm219_vm1, %v327_v19  ;;  %v331_v22 = vmul.f32 %v327_v19, %v295_v57 }
 0x138   :  { %v334_v26 = vadd.f32 %v333_v23, %v331_v22 }
 0x139   :  { %v360_v29 = vld [vmem:[#allocation2 + $0x6] sm:$0x3] }
 0x13a   :  { %335 = vst.msk [vmem:[#allocation2 + $0xa] sm:$0x3] %vm219_vm1, %v334_v26  ;;  %v338_v30 = vmul.f32 %v334_v26, %v295_v57  ;;  %v387_v33 = vcombine.low %v359_v28, %v360_v29 }
 0x13c   :  { %v341_v35 = vadd.f32 %v340_v31, %v338_v30  ;;  %v401_v37 = vrot.slane %v387_v33, %v870_v8 }
 0x13d   :  { %v361_v48 = vld [vmem:[#allocation2 + $0x8] sm:$0x3] }
 0x13e   :  { %342 = vst.msk [vmem:[#allocation2 + $0xc] sm:$0x3] %vm219_vm1, %v341_v35  ;;  %v345_v39 = vmul.f32 %v341_v35, %v295_v57  ;;  %v402_v42 = vcombine.low %v394_v36, %v401_v37 }
 0x140   :  { %v348_v43 = vadd.f32 %v347_v40, %v345_v39  ;;  %637 = vmatmul.mubr.msk.f32.vlgmr.msra.gmra.mrb[0].mxu1 %vm132_vm0, %v402_v42 }
 0x141   :  { %639 = vmatprep.mubr.msk.f32.mxu1 %vm774_vm2, %v775_v38  ;;  %v362_v47 = vld [vmem:[#allocation2 + $0xa] sm:$0x3] }
 0x142   :  { %349 = vst.msk [vmem:[#allocation2 + $0xe] sm:$0x3] %vm219_vm1, %v348_v43  ;;  %v352_v44 = vmul.f32 %v348_v43, %v295_v57  ;;  %v403_v49 = vcombine.low %v361_v48, %v362_v47  ;;  %v599_v57 = vld [vmem:[%s964_s7] ss:$0 sm:$0xff]  ;;  %s776_s7 = smov [#allocation9]  }
 0x143   :  { %s580_s26 = sshll.u32 %s776_s7, 4  ;;  %s581_s26 = int_to_ptr.vmem [resolvable:$true] %s580_s26 }
 0x144   :  { %v355_v46 = vadd.f32 %v354_v45, %v352_v44  ;;  %v411_v53 = vrot.slane %v403_v49, %v870_v8  ;;  %s737_s27 = scalar_lea.vmem %s581_s26, 288  ;;  %p742_p11 = scmp.lt.s32.totalorder %s581_s26, %s581_s26 }
 0x145   :  { %v363_v50 = vld [vmem:[#allocation2 + $0xc] sm:$0x3]  ;;  %p738_p10 = scmp.ne.s32.totalorder %s581_s26, %s737_s27  ;;  %p743_p12 = scmp.lt.s32.totalorder %s737_s27, %s737_s27 }
 0x146   :  { %356 = vst.msk [vmem:[#allocation2 + $0x10] sm:$0x3] %vm219_vm1, %v355_v46 }
 0x147   :  { %p744_p13 = por %p743_p12, %p742_p11 }
 0x149   :  { %v364_v51 = vld [vmem:[#allocation2 + $0xe] sm:$0x3]  ;;  %p745_p0 = pnand %p744_p13, %p738_p10 }
 0x14a   :  { %v404_v52 = vcombine.low %v363_v50, %v364_v51 }
 0x14c   :  { %v418_v54 = vrot.slane %v404_v52, %v870_v8 }
 0x14d   :  { %v600_v56 = vld.sshfl [vmem:[#allocation2 + $0x10] sm:$0x3 pattern:$0x76325410] }
 0x14e   :  { %v419_v55 = vcombine.low %v411_v53, %v418_v54 }
 0x150   :  { %640 = vmatmul.mubr.msk.f32.gmra.mrb[2].mxu1 %vm132_vm0, %v419_v55 }
 0x151   :  { %642 = vmatprep.mubr.msk.f32.mxu1 %vm774_vm2, %v775_v38 }
 0x154   :  { %643 = vmatmul.mubr.msk.f32.gmra.mrb[4].mxu1 %vm132_vm0, %v600_v56 }
 0x213   :  { %v499_v58 = vpop.f32.mrb[0].mxu1 }
 0x214   :  { %v500_v59 = vadd.f32 %v599_v57, %v499_v58  ;;  %v638_v60 = vpop.f32.mrb[1].mxu1 }
 0x216   :  { %v516_v61 = vcombine.high %v500_v59, %v500_v59  ;;  %v523_v62 = vrot.slane %v500_v59, %v870_v8 }
 0x218   :  { %v530_v63 = vrot.slane %v516_v61, %v870_v8  ;;  %v531_v0 = vcombine.high %v523_v62, %v523_v62  ;;  %566 = vst.msk [vmem:[#allocation9] sm:$0x3] %vm219_vm1, %v523_v62 }
 0x21a   :  { %v532_v1 = vcombine.high %v530_v63, %v530_v63  ;;  %567 = vst.msk [vmem:[#allocation9 + $0x2] sm:$0x3] %vm219_vm1, %v531_v0  ;;  %568 = vst.msk [vmem:[#allocation9 + $0x4] sm:$0x3] %vm219_vm1, %v530_v63 }
 0x21c   :  { %569 = vst.msk [vmem:[#allocation9 + $0x6] sm:$0x3] %vm219_vm1, %v532_v1 }
 0x223   :  { %v504_v38 = vpop.f32.mrb[2].mxu1 }
 0x224   :  { %v505_v2 = vadd.f32 %v599_v57, %v504_v38  ;;  %v641_v3 = vpop.f32.mrb[3].mxu1 }
 0x226   :  { %v533_v4 = vcombine.high %v505_v2, %v505_v2  ;;  %v540_v5 = vrot.slane %v505_v2, %v870_v8 }
 0x227   :  { %v509_v6 = vpop.f32.mrb[4].mxu1 }
 0x228   :  { %v547_v7 = vrot.slane %v533_v4, %v870_v8  ;;  %v548_v9 = vcombine.high %v540_v5, %v540_v5  ;;  %570 = vst.msk [vmem:[#allocation9 + $0x8] sm:$0x3] %vm219_vm1, %v540_v5  ;;  %v510_v10 = vadd.f32 %v599_v57, %v509_v6  ;;  %v644_v11 = vpop.f32.mrb[5].mxu1 }
 0x22a   :  { %v549_v12 = vcombine.high %v547_v7, %v547_v7  ;;  %571 = vst.msk [vmem:[#allocation9 + $0xa] sm:$0x3] %vm219_vm1, %v548_v9  ;;  %572 = vst.msk [vmem:[#allocation9 + $0xc] sm:$0x3] %vm219_vm1, %v547_v7  ;;  %v556_v13 = vrot.slane %v510_v10, %v870_v8 }
 0x22c   :  { %573 = vst.msk [vmem:[#allocation9 + $0xe] sm:$0x3] %vm219_vm1, %v549_v12  ;;  %574 = vst.msk [vmem:[#allocation9 + $0x10] sm:$0x3] %vm219_vm1, %v556_v13 }
 0x22d   :  { %748 = shalt.err (!%p745_p0)
}
 0x22e   :  { %s749_s9 = scalar_lea.hbm %s965_s8, 288 }
 0x22f   :  { %p750_p1 = scmp.ne.s32.totalorder %s965_s8, %s749_s9  ;;  %p753_p2 = scmp.lt.u32.totalorder %s749_s9, %s965_s8 }
 0x231   :  { %p755_p3 = pnand %p753_p2, %p750_p1 }
 0x233   :  { %758 = shalt.err (!%p755_p3)
}
 0x234   :  { %586 = dma.vmem_to_hbm [thread:$0]  %s581_s26, 288, %s965_s8, [#allocation5], %s769_s1, %s769_s1, %s770_s28  }
 0x235   :  { %763 = dma.done.wait [#allocation5], 288  }
 0x236   :  { %764 = vsyncadd [#allocation5], 4294967008 }
 0x237   :  { %590 = vsyncpa [#allocation4], 1 }
 0x238   :  { %591 = vsyncpa [#allocation7], 1 }
 0x239   :  { %592 = vsyncpa [#allocation5], 1 }

</bundles_post_ra>
